<compile_context>
chip_gen: v6e
topology: v6e:2x2x1
jax: 0.10.0
libtpu: 0.0.40
codegen_flags: <defaults>
</compile_context>

<pallas_src>
import functools
import math

import jax
import jax.numpy as jnp
from jax.experimental import pallas as pl
from jax.experimental.pallas import tpu as pltpu


def _mlp_kernel(x_ref, w1_ref, b1_ref, w2_ref, b2_ref, w3_ref, b3_ref, o_ref):
    # Batch-on-lane layout: x_ref is (2, Bt); every activation is (features, Bt),
    # so all stores are lane-dense (Bt is a multiple of 128).
    x = x_ref[...]                      # (2, Bt)
    w1 = w1_ref[...]                    # (16, 2)

    # Layer 1 (K=2) on the VPU: two broadcast FMAs; a (16,2)@(2,Bt) MXU matmul
    # would waste nearly the whole systolic array and still pay fill/drain.
    h1 = w1[:, 0:1] * x[0:1, :] + w1[:, 1:2] * x[1:2, :] + b1_ref[...]  # (16, Bt)
    h1 = jnp.maximum(h1, 0.0)

    # Layer 2 on the MXU: (32,16) @ (16,Bt) -> (32,Bt)
    h2 = jnp.dot(w2_ref[...], h1, preferred_element_type=jnp.float32) + b2_ref[...]
    h2 = jnp.maximum(h2, 0.0)

    # Layer 3 on the MXU: (2,32) @ (32,Bt) -> (2,Bt); lane-dense store.
    # TODO(synk): only if a bundle dump shows vst.msk dominating the epilogue,
    # pad out-features 2->8 in the wrapper for unmasked 8-sublane stores.
    o_ref[...] = (jnp.dot(w3_ref[...], h2, preferred_element_type=jnp.float32)
                  + b3_ref[...]).astype(o_ref.dtype)


def _round_up(x, m):
    return ((x + m - 1) // m) * m


def _choose_tiling(B, max_tile):
    """Pick (batch_tile, num_tiles).

    - If the 128-rounded batch fits in one tile -> ONE grid step (per-step
      overhead dominates this tiny workload, so fewer/fatter steps win).
    - Otherwise use an EVEN number of tiles so v7x's two TensorCores get a
      balanced split under the "parallel" grid axis (no cost on v5e/v6e).
    """
    single = _round_up(B, 128)
    if single <= max_tile:
        return single, 1
    num_tiles = 2
    while _round_up(-(-B // num_tiles), 128) > max_tile:
        num_tiles += 2
    batch_tile = _round_up(-(-B // num_tiles), 128)
    return batch_tile, num_tiles


def generator_forward_t(x_t, params, *, max_tile=4096):
    """Forward pass in batch-on-lane layout: x_t is (2, B), returns (2, B).

    Callers that keep the (2, B) layout at the interface avoid the wrapper
    transpose HBM passes entirely.
    """
    B = x_t.shape[1]
    w1, b1, w2, b2, w3, b3 = (params[k] for k in ("w1", "b1", "w2", "b2", "w3", "b3"))

    batch_tile, num_tiles = _choose_tiling(B, max_tile)
    Bp = batch_tile * num_tiles
    if Bp != B:
        x_t = jnp.pad(x_t, ((0, 0), (0, Bp - B)))

    def full_block(arr):
        # whole (untiled) weight/bias block, identical for every batch tile
        return pl.BlockSpec(arr.shape, lambda i: (0, 0))

    out_t = pl.pallas_call(
        _mlp_kernel,
        out_shape=jax.ShapeDtypeStruct((2, Bp), jnp.float32),
        grid_spec=pltpu.PrefetchScalarGridSpec(
            num_scalar_prefetch=0,
            grid=(num_tiles,),
            in_specs=[
                pl.BlockSpec((2, batch_tile), lambda i: (0, i)),   # x tile
                full_block(w1), full_block(b1),
                full_block(w2), full_block(b2),
                full_block(w3), full_block(b3),
            ],
            out_specs=pl.BlockSpec((2, batch_tile), lambda i: (0, i)),
        ),
        compiler_params=pltpu.CompilerParams(
            dimension_semantics=("parallel",)),
    )(x_t, w1, b1, w2, b2, w3, b3)

    if Bp != B:
        out_t = out_t[:, :B]
    return out_t


@functools.partial(jax.jit, static_argnames=("max_tile",))
def generator_forward(x, params, *, max_tile=4096):
    """PyTorch-layout forward: x (B, 2) -> (B, 2).

    jit'ed so the transpose+pad on the way in and the slice+transpose on the
    way out each fuse into a single HBM pass around the Pallas call.
    """
    return generator_forward_t(x.T, params, max_tile=max_tile).T


def init_generator_params(key):
    """Deterministic init matching nn.Linear default: U(-1/sqrt(fan_in), 1/sqrt(fan_in)).

    Weights kept in PyTorch (out_features, in_features) layout; biases as (out, 1).
    """
    dims = [(2, 16), (16, 32), (32, 2)]
    params = {}
    keys = jax.random.split(key, 2 * len(dims))
    for li, (fan_in, fan_out) in enumerate(dims):
        bound = 1.0 / math.sqrt(fan_in)
        w = jax.random.uniform(keys[2 * li], (fan_out, fan_in),
                               minval=-bound, maxval=bound, dtype=jnp.float32)
        b = jax.random.uniform(keys[2 * li + 1], (fan_out, 1),
                               minval=-bound, maxval=bound, dtype=jnp.float32)
        params[f"w{li + 1}"] = w
        params[f"b{li + 1}"] = b
    return params


def generator_reference(x, params):
    h = jnp.maximum(x @ params["w1"].T + params["b1"].T, 0.0)
    h = jnp.maximum(h @ params["w2"].T + params["b2"].T, 0.0)
    return h @ params["w3"].T + params["b3"].T


if __name__ == "__main__":
    key = jax.random.PRNGKey(0)
    pkey, k_small, k_med, k_big = jax.random.split(key, 4)
    params = init_generator_params(pkey)

    # Small batch (module-consistent shape): single grid step padded only to 128.
    B_small = 8
    x_small = jax.random.normal(k_small, (B_small, 2), dtype=jnp.float32)
    out_small = jax.block_until_ready(generator_forward(x_small, params))
    ref_small = generator_reference(x_small, params)
    assert out_small.shape == (B_small, 2)
    assert jnp.allclose(out_small, ref_small, atol=1e-5, rtol=1e-5)

    # Medium batch: previously 3 grid steps of 512, now ONE step of 1536.
    B_med = 1536
    x_med = jax.random.normal(k_med, (B_med, 2), dtype=jnp.float32)
    out_med = jax.block_until_ready(generator_forward(x_med, params))
    ref_med = generator_reference(x_med, params)
    assert out_med.shape == (B_med, 2)
    assert jnp.allclose(out_med, ref_med, atol=1e-5, rtol=1e-5)

    # Large batch: exercises the multi-tile path with an even tile count
    # (4 tiles of 2560) for balanced v7x dual-TensorCore sharding.
    B_big = 10240
    x_big = jax.random.normal(k_big, (B_big, 2), dtype=jnp.float32)
    out_big = jax.block_until_ready(generator_forward(x_big, params))
    ref_big = generator_reference(x_big, params)
    assert out_big.shape == (B_big, 2)
    assert jnp.allclose(out_big, ref_big, atol=1e-5, rtol=1e-5)

    print("KERNEL_OK")
</pallas_src>

<mosaic_0001>
module attributes {stable_mosaic.version = 11 : i64} {
  func.func @_mlp_kernel(%arg0: i32, %arg1: memref<2x128xf32, #tpu.memory_space<vmem>>, %arg2: memref<16x2xf32, #tpu.memory_space<vmem>>, %arg3: memref<16x1xf32, #tpu.memory_space<vmem>>, %arg4: memref<32x16xf32, #tpu.memory_space<vmem>>, %arg5: memref<32x1xf32, #tpu.memory_space<vmem>>, %arg6: memref<2x32xf32, #tpu.memory_space<vmem>>, %arg7: memref<2x1xf32, #tpu.memory_space<vmem>>, %arg8: memref<2x128xf32, #tpu.memory_space<vmem>>) attributes {dimension_semantics = [#tpu.dimension_semantics<parallel>], iteration_bounds = array<i64: 1>, scalar_prefetch = 0 : i64, scratch_operands = 0 : i64, tpu.core_type = #tpu.core_type<tc>, window_params = [{transform_indices = @transform_0, window_bounds = array<i64: 2, 128>}, {pipeline_mode = #tpu.pipeline_mode<synchronous>, transform_indices = @transform_1, window_bounds = array<i64: 16, 2>}, {pipeline_mode = #tpu.pipeline_mode<synchronous>, transform_indices = @transform_2, window_bounds = array<i64: 16, 1>}, {pipeline_mode = #tpu.pipeline_mode<synchronous>, transform_indices = @transform_3, window_bounds = array<i64: 32, 16>}, {pipeline_mode = #tpu.pipeline_mode<synchronous>, transform_indices = @transform_4, window_bounds = array<i64: 32, 1>}, {pipeline_mode = #tpu.pipeline_mode<synchronous>, transform_indices = @transform_5, window_bounds = array<i64: 2, 32>}, {pipeline_mode = #tpu.pipeline_mode<synchronous>, transform_indices = @transform_6, window_bounds = array<i64: 2, 1>}, {transform_indices = @transform_7, window_bounds = array<i64: 2, 128>}]} {
    %c0 = arith.constant 0 : index
    %c0_0 = arith.constant 0 : index
    %0 = vector.load %arg1[%c0, %c0_0] : memref<2x128xf32, #tpu.memory_space<vmem>>, vector<2x128xf32>
    %c0_1 = arith.constant 0 : index
    %c0_2 = arith.constant 0 : index
    %1 = vector.load %arg2[%c0_1, %c0_2] : memref<16x2xf32, #tpu.memory_space<vmem>>, vector<16x2xf32>
    %2 = vector.extract_strided_slice %1 {offsets = [0, 0], sizes = [16, 1], strides = [1, 1]} : vector<16x2xf32> to vector<16x1xf32>
    %3 = vector.extract_strided_slice %0 {offsets = [0, 0], sizes = [1, 128], strides = [1, 1]} : vector<2x128xf32> to vector<1x128xf32>
    %4 = vector.broadcast %2 : vector<16x1xf32> to vector<16x128xf32>
    %5 = vector.broadcast %3 : vector<1x128xf32> to vector<16x128xf32>
    %6 = arith.mulf %4, %5 : vector<16x128xf32>
    %7 = vector.extract_strided_slice %1 {offsets = [0, 1], sizes = [16, 1], strides = [1, 1]} : vector<16x2xf32> to vector<16x1xf32>
    %8 = vector.extract_strided_slice %0 {offsets = [1, 0], sizes = [1, 128], strides = [1, 1]} : vector<2x128xf32> to vector<1x128xf32>
    %9 = vector.broadcast %7 : vector<16x1xf32> to vector<16x128xf32>
    %10 = vector.broadcast %8 : vector<1x128xf32> to vector<16x128xf32>
    %11 = arith.mulf %9, %10 : vector<16x128xf32>
    %12 = arith.addf %6, %11 : vector<16x128xf32>
    %c0_3 = arith.constant 0 : index
    %c0_4 = arith.constant 0 : index
    %13 = vector.load %arg3[%c0_3, %c0_4] : memref<16x1xf32, #tpu.memory_space<vmem>>, vector<16x1xf32>
    %14 = vector.broadcast %13 : vector<16x1xf32> to vector<16x128xf32>
    %15 = arith.addf %12, %14 : vector<16x128xf32>
    %cst = arith.constant 0.000000e+00 : f32
    %16 = vector.broadcast %cst : f32 to vector<16x128xf32>
    %17 = arith.maximumf %15, %16 : vector<16x128xf32>
    %c0_5 = arith.constant 0 : index
    %c0_6 = arith.constant 0 : index
    %18 = vector.load %arg4[%c0_5, %c0_6] : memref<32x16xf32, #tpu.memory_space<vmem>>, vector<32x16xf32>
    %cst_7 = arith.constant dense<0.000000e+00> : vector<32x128xf32>
    %19 = tpu.matmul %18, %17, %cst_7 {dimension_numbers = #tpu.dot_dimension_numbers<[1], [0], [0], [1], [0, 0, 1, 1], [], []>} : vector<32x16xf32>, vector<16x128xf32>, vector<32x128xf32> -> vector<32x128xf32>
    %c0_8 = arith.constant 0 : index
    %c0_9 = arith.constant 0 : index
    %20 = vector.load %arg5[%c0_8, %c0_9] : memref<32x1xf32, #tpu.memory_space<vmem>>, vector<32x1xf32>
    %21 = vector.broadcast %20 : vector<32x1xf32> to vector<32x128xf32>
    %22 = arith.addf %19, %21 : vector<32x128xf32>
    %cst_10 = arith.constant 0.000000e+00 : f32
    %23 = vector.broadcast %cst_10 : f32 to vector<32x128xf32>
    %24 = arith.maximumf %22, %23 : vector<32x128xf32>
    %c0_11 = arith.constant 0 : index
    %c0_12 = arith.constant 0 : index
    %25 = vector.load %arg6[%c0_11, %c0_12] : memref<2x32xf32, #tpu.memory_space<vmem>>, vector<2x32xf32>
    %cst_13 = arith.constant dense<0.000000e+00> : vector<2x128xf32>
    %26 = tpu.matmul %25, %24, %cst_13 {dimension_numbers = #tpu.dot_dimension_numbers<[1], [0], [0], [1], [0, 0, 1, 1], [], []>} : vector<2x32xf32>, vector<32x128xf32>, vector<2x128xf32> -> vector<2x128xf32>
    %c0_14 = arith.constant 0 : index
    %c0_15 = arith.constant 0 : index
    %27 = vector.load %arg7[%c0_14, %c0_15] : memref<2x1xf32, #tpu.memory_space<vmem>>, vector<2x1xf32>
    %28 = vector.broadcast %27 : vector<2x1xf32> to vector<2x128xf32>
    %29 = arith.addf %26, %28 : vector<2x128xf32>
    %c0_16 = arith.constant 0 : index
    %c0_17 = arith.constant 0 : index
    %30 = vector.load %arg8[%c0_16, %c0_17] : memref<2x128xf32, #tpu.memory_space<vmem>>, vector<2x128xf32>
    tpu.vector_store %arg8[%c0_16, %c0_17], %29 {strides = array<i32>} : memref<2x128xf32, #tpu.memory_space<vmem>>, vector<2x128xf32>,
    return
  }
  func.func @transform_0(%arg0: i32) -> (i32, i32) {
    %c0_i32 = arith.constant 0 : i32
    %c0_i32_0 = arith.constant 0 : i32
    return %c0_i32, %arg0 : i32, i32
  }
  func.func @transform_1(%arg0: i32) -> (i32, i32) {
    %c0_i32 = arith.constant 0 : i32
    %c0_i32_0 = arith.constant 0 : i32
    %c0_i32_1 = arith.constant 0 : i32
    return %c0_i32, %c0_i32_0 : i32, i32
  }
  func.func @transform_2(%arg0: i32) -> (i32, i32) {
    %c0_i32 = arith.constant 0 : i32
    %c0_i32_0 = arith.constant 0 : i32
    %c0_i32_1 = arith.constant 0 : i32
    return %c0_i32, %c0_i32_0 : i32, i32
  }
  func.func @transform_3(%arg0: i32) -> (i32, i32) {
    %c0_i32 = arith.constant 0 : i32
    %c0_i32_0 = arith.constant 0 : i32
    %c0_i32_1 = arith.constant 0 : i32
    return %c0_i32, %c0_i32_0 : i32, i32
  }
  func.func @transform_4(%arg0: i32) -> (i32, i32) {
    %c0_i32 = arith.constant 0 : i32
    %c0_i32_0 = arith.constant 0 : i32
    %c0_i32_1 = arith.constant 0 : i32
    return %c0_i32, %c0_i32_0 : i32, i32
  }
  func.func @transform_5(%arg0: i32) -> (i32, i32) {
    %c0_i32 = arith.constant 0 : i32
    %c0_i32_0 = arith.constant 0 : i32
    %c0_i32_1 = arith.constant 0 : i32
    return %c0_i32, %c0_i32_0 : i32, i32
  }
  func.func @transform_6(%arg0: i32) -> (i32, i32) {
    %c0_i32 = arith.constant 0 : i32
    %c0_i32_0 = arith.constant 0 : i32
    %c0_i32_1 = arith.constant 0 : i32
    return %c0_i32, %c0_i32_0 : i32, i32
  }
  func.func @transform_7(%arg0: i32) -> (i32, i32) {
    %c0_i32 = arith.constant 0 : i32
    %c0_i32_0 = arith.constant 0 : i32
    return %c0_i32, %arg0 : i32, i32
  }
}

</mosaic_0001>

<bundles_post_ra>
// kernel: generator_forward.1
= control target key start
LH: loop header
LB: loop body
LE: loop exit
PB: predicated region body
PF: predicated region fallthrough
CT: control target
= control target key end

     0   :  { %v340_v0 = vmov 0   ;;  %v341_v3 = vmov 1   ;;  %vm105_vm0 = vcmask 130048   ;;  %v39_v12 = vlaneseq  ;;  %s436_s1 = inlined_call_operand.vmem [shape: f32[16,2], index: 1, kind: input, shape index: {}]   ;;  %s437_s2 = inlined_call_operand.vmem [shape: f32[16,1], index: 2, kind: input, shape index: {}]   ;;  %s438_s4 = inlined_call_operand.vmem [shape: f32[32,1], index: 4, kind: input, shape index: {}]   ;;  %s439_s3 = inlined_call_operand.vmem [shape: f32[32,16], index: 3, kind: input, shape index: {}]   ;;  %s440_s6 = inlined_call_operand.vmem [shape: f32[2,1], index: 6, kind: input, shape index: {}]   ;;  %s441_s0 = inlined_call_operand.vmem [shape: f32[2,128], index: 0, kind: input, shape index: {}]   ;;  %s442_s5 = inlined_call_operand.vmem [shape: f32[2,32], index: 5, kind: input, shape index: {}]   ;;  %s443_s7 = inlined_call_operand.vmem [shape: f32[2,128], index: 7, kind: output, shape index: {}]  }
   0x1   :  { %336 = vset.pattern.permute.xlu1 %v340_v0  ;;  %334 = vset.pattern.permute.xlu0 %v340_v0  ;;  %v28_v1 = vld [vmem:[%s436_s1 + $0x8] sm:$0xff]  ;;  %v27_v2 = vld [vmem:[%s436_s1] sm:$0xff]  ;;  %v84_v7 = vld [vmem:[%s438_s4 + $0x18] sm:$0xff]  ;;  %v342_v38 = vmov 0.0   ;;  %vm343_vm1 = vmmov 0   ;;  %vm214_vm2 = vcmask 261120  }
   0x2   :  { %36 = vperm.xlu0 %334, %v28_v1   ;;  %31 = vperm.xlu1 %336, %v27_v2   ;;  %v61_v4 = vld [vmem:[%s437_s2] sm:$0xff]  ;;  %v62_v5 = vld [vmem:[%s437_s2 + $0x8] sm:$0xff]  ;;  %v83_v10 = vld [vmem:[%s438_s4 + $0x10] sm:$0xff]  ;;  %v40_v13 = vshrl.u32 %v39_v12, 7 }
   0x3   :  { %v82_v6 = vld [vmem:[%s438_s4 + $0x8] sm:$0xff]  ;;  %v77_v8 = vld [vmem:[%s439_s3] sm:$0xff]  ;;  %v79_v36 = vld [vmem:[%s439_s3 + $0x10] sm:$0xff]  ;;  %319 = vmatprep.subr.mxu1 %v342_v38  ;;  %327 = vmatprep.mubr.msk.f32.mxu1 %vm343_vm1, %v342_v38 }
   0x4   :  { %313 = vmatprep.mubr.msk.f32.mxu0 %vm105_vm0, %v77_v8  ;;  %v208_v9 = vld [vmem:[%s440_s6] sm:$0x3]  ;;  %v41_v14 = vsub.s32 0, %v40_v13  ;;  %v55_v15 = vsub.s32 1, %v40_v13  ;;  %v78_v35 = vld [vmem:[%s439_s3 + $0x8] sm:$0xff]  ;;  %v80_v37 = vld [vmem:[%s439_s3 + $0x18] sm:$0xff] }
   0x5   :  { %v81_v11 = vld [vmem:[%s438_s4] sm:$0xff] }
   0x6   :  { %335 = vset.pattern.permute.xlu0 %v341_v3  ;;  %337 = vset.pattern.permute.xlu1 %v341_v3  ;;  %v26_v16 = vld [vmem:[%s441_s0] sm:$0x3] }
   0x7   :  { %50 = vperm.xlu0 %335, %v28_v1   ;;  %46 = vperm.xlu1 %337, %v27_v2   ;;  %v42_v19 = vrot.slane %v26_v16, %v41_v14  ;;  %v56_v20 = vrot.slane %v26_v16, %v55_v15  ;;  %v207_v55 = vld [vmem:[%s442_s5] sm:$0x3] }
   0xb   :  { %339 = vset.pattern.permute.xlu0 %v340_v0  ;;  %338 = vset.pattern.permute.xlu1 %v340_v0 }
   0xc   :  { %65 = vperm.xlu0 %339, %v61_v4   ;;  %70 = vperm.xlu1 %338, %v62_v5  }
  0x10   :  { %92 = vperm.xlu0 %339, %v82_v6   ;;  %102 = vperm.xlu1 %338, %v84_v7  }
  0x14   :  { %211 = vperm.xlu0 %339, %v208_v9   ;;  %97 = vperm.xlu1 %338, %v83_v10  }
  0x18   :  { %87 = vperm.xlu1 %338, %v81_v11  }
  0x7d   :  { %v32_v17 = vpop.permute.xlu1 %31  ;;  %v37_v18 = vpop.permute.xlu0 %36 }
  0x7e   :  { %v43_v23 = vmul.f32 %v42_v19, %v32_v17  ;;  %v44_v24 = vmul.f32 %v42_v19, %v37_v18 }
  0x82   :  { %v51_v21 = vpop.permute.xlu0 %50  ;;  %v47_v22 = vpop.permute.xlu1 %46 }
  0x83   :  { %v58_v25 = vmul.f32 %v56_v20, %v51_v21  ;;  %v57_v26 = vmul.f32 %v56_v20, %v47_v22 }
  0x85   :  { %v59_v27 = vadd.f32 %v57_v26, %v43_v23  ;;  %v60_v28 = vadd.f32 %v58_v25, %v44_v24 }
  0x87   :  { %v66_v29 = vpop.permute.xlu0 %65  ;;  %v71_v30 = vpop.permute.xlu1 %70 }
  0x88   :  { %v73_v31 = vadd.f32 %v66_v29, %v59_v27  ;;  %v74_v32 = vadd.f32 %v71_v30, %v60_v28 }
  0x8a   :  { %v76_v33 = vmax.f32 %v74_v32, 0.0  ;;  %v75_v34 = vmax.f32 %v73_v31, 0.0 }
  0x8b   :  { %v103_v39 = vpop.permute.xlu1 %102  ;;  %v93_v45 = vpop.permute.xlu0 %92 }
  0x8c   :  { %309 = vmatprep.subr.mxu0 %v76_v33 }
  0x8d   :  { %310 = vmatpush3.msra.mxu0 %v76_v33 }
  0x8e   :  { %311 = vmatprep.subr.mxu0 %v75_v34 }
  0x8f   :  { %312 = vmatpush3.msra.mxu0 %v75_v34  ;;  %v98_v41 = vpop.permute.xlu1 %97  ;;  %v212_v56 = vpop.permute.xlu0 %211 }
  0x90   :  { %314 = vmatmul.mubr.msk.f32.vlgmr.msra.gmra.mxu0 %vm105_vm0, %v78_v35 }
  0x91   :  { %316 = vmatprep.mubr.msk.f32.mxu0 %vm105_vm0, %v79_v36 }
  0x93   :  { %v88_v50 = vpop.permute.xlu1 %87 }
  0x94   :  { %317 = vmatmul.mubr.msk.f32.gmra.mxu0 %vm105_vm0, %v80_v37 }
 0x150   :  { %v315_v40 = vpop.f32.mrf.mxu0 }
 0x151   :  { %v190_v47 = vadd.f32 %v315_v40, %v93_v45 }
 0x152   :  { %v184_v42 = vpop.f32.mrf.mxu0 }
 0x153   :  { %v185_v51 = vadd.f32 %v184_v42, %v88_v50  ;;  %v204_v53 = vmax.f32 %v190_v47, 0.0 }
 0x154   :  { %v318_v43 = vpop.f32.mrf.mxu0 }
 0x155   :  { %v200_v44 = vadd.f32 %v318_v43, %v103_v39  ;;  %v203_v54 = vmax.f32 %v185_v51, 0.0 }
 0x156   :  { %v194_v46 = vpop.f32.mrf.mxu0 }
 0x157   :  { %v206_v48 = vmax.f32 %v200_v44, 0.0  ;;  %v195_v49 = vadd.f32 %v194_v46, %v98_v41 }
 0x159   :  { %v205_v52 = vmax.f32 %v195_v49, 0.0  ;;  %320 = vmatpush3.msra.mxu1 %v206_v48 }
 0x15a   :  { %321 = vmatprep.subr.mxu1 %v342_v38 }
 0x15b   :  { %322 = vmatpush3.msra.mxu1 %v205_v52 }
 0x15c   :  { %323 = vmatprep.subr.mxu1 %v342_v38 }
 0x15d   :  { %324 = vmatpush3.msra.mxu1 %v204_v53 }
 0x15e   :  { %325 = vmatprep.subr.mxu1 %v342_v38 }
 0x15f   :  { %326 = vmatpush3.msra.mxu1 %v203_v54 }
 0x160   :  { %328 = vmatmul.mubr.msk.f32.vlgmr.msra.gmra.mxu1 %vm214_vm2, %v207_v55 }
 0x220   :  { %v284_v57 = vpop.f32.mrf.mxu1 }
 0x221   :  { %v285_v58 = vadd.f32 %v284_v57, %v212_v56 }
 0x222   :  { %v329_v59 = vpop.f32.mrf.mxu1 }
 0x223   :  { %288 = vst [vmem:[%s443_s7] sm:$0x3] %v285_v58 }

</bundles_post_ra>
